<compile_context>
chip_gen: v7x
topology: tpu7x:2x2x1
jax: 0.10.0
libtpu: 0.0.40
codegen_flags: <defaults>
</compile_context>

<pallas_src>
import jax
import jax.numpy as jnp
from jax.experimental import pallas as pl
from jax.experimental.pallas import tpu as pltpu

LANES = 128
SUBLANES = 8


def _min_sublanes(dtype):
    # Native sublane packing: 4-byte -> 8, 2-byte (bf16) -> 16, 1-byte -> 32.
    return {4: 8, 2: 16, 1: 32}.get(jnp.dtype(dtype).itemsize, 8)


def _make_ssd_kernel(tile_rows, valid_rows, half_tiles, need_mask):
    """sum((a - b)^2) partial-reduction kernel.

    Grid: (num_splits, half_tiles, L).  Output block (8, 128) per split holds
    a per-lane partial sum; the final reduction happens in the wrapper.
    """

    def kernel(a_ref, b_ref, o_ref):
        c = pl.program_id(0)   # core split (parallel, v7x megacore)
        i = pl.program_id(1)   # row tile within this split
        l = pl.program_id(2)   # layer (innermost: b tile stays resident)

        @pl.when(jnp.logical_and(i == 0, l == 0))
        def _():
            o_ref[...] = jnp.zeros_like(o_ref)

        a = a_ref[...].astype(jnp.float32)
        b = b_ref[...].astype(jnp.float32)
        d = a - b
        sq = d * d

        if need_mask:
            # Zero rows past the valid range: partial edge block, or a clamped
            # duplicate block when the core split does not divide evenly.
            row0 = (c * half_tiles + i) * tile_rows
            ridx = row0 + jax.lax.broadcasted_iota(
                jnp.int32, (tile_rows, LANES), 0)
            sq = jnp.where(ridx < valid_rows, sq, 0.0)

        # Reduce only along the sublane-tile axis (elementwise vreg adds on the
        # VPU); keep the (8, 128) lane structure for the accumulator.
        o_ref[...] += sq.reshape(tile_rows // SUBLANES, SUBLANES, LANES).sum(axis=0)

    return kernel


def _pallas_sum_sq_diff(a_ln, b_n, *, tile_rows=1024):
    """sum_{l, e} (a_ln[l, e] - b_n[e])**2 as float32.

    a_ln: (L, n), b_n: (n,).  The broadcast of b over L is expressed through
    the index_map; b is never materialized L times.
    """
    L, n = a_ln.shape
    assert b_n.shape == (n,), (a_ln.shape, b_n.shape)

    min_sub = max(_min_sublanes(a_ln.dtype), _min_sublanes(b_n.dtype))
    rows = n // LANES
    rows_main = (rows // min_sub) * min_sub      # rows handled by the kernel
    main = rows_main * LANES                     # elements handled by the kernel

    # Tiny remainder (< min_sub*128 + 127 elements per layer) in plain JAX.
    tail = jnp.zeros((), jnp.float32)
    if main < n:
        da = (a_ln[:, main:].astype(jnp.float32)
              - b_n[main:].astype(jnp.float32)[None, :])
        tail = jnp.sum(da * da)
    if rows_main == 0:
        return tail

    # Row-tile size: as large as possible (<= tile_rows), a multiple of the
    # dtype's sublane packing, never larger than the array.
    tr = min(tile_rows, rows_main)
    tr = max(min_sub, (tr // min_sub) * min_sub)

    row_tiles = -(-rows_main // tr)
    num_splits = 2 if row_tiles >= 2 else 1      # v7x: one row slab per TC
    half = -(-row_tiles // num_splits)           # row tiles per split
    need_mask = (num_splits * half * tr) != rows_main
    max_blk = row_tiles - 1

    # Views only (no jnp.pad, no dtype cast). The prefix slice is the identity
    # unless n is ragged (then only the main slab is materialized once).
    a3 = a_ln[:, :main].reshape(L, rows_main, LANES)
    b2 = b_n[:main].reshape(rows_main, LANES)

    a_spec = pl.BlockSpec(
        (None, tr, LANES),
        lambda c, i, l: (l, jnp.minimum(c * half + i, max_blk), 0))
    b_spec = pl.BlockSpec(               # ignores l -> x re-used across layers
        (tr, LANES),
        lambda c, i, l: (jnp.minimum(c * half + i, max_blk), 0))
    out_spec = pl.BlockSpec((SUBLANES, LANES), lambda c, i, l: (c, 0))

    bytes_accessed = (a3.size * a3.dtype.itemsize
                      + b2.size * b2.dtype.itemsize
                      + num_splits * SUBLANES * LANES * 4)

    partials = pl.pallas_call(
        _make_ssd_kernel(tr, rows_main, half, need_mask),
        out_shape=jax.ShapeDtypeStruct((num_splits * SUBLANES, LANES),
                                       jnp.float32),
        grid_spec=pltpu.PrefetchScalarGridSpec(
            num_scalar_prefetch=0,
            grid=(num_splits, half, L),
            in_specs=[a_spec, b_spec],
            out_specs=out_spec,
        ),
        compiler_params=pltpu.CompilerParams(
            dimension_semantics=("parallel", "arbitrary", "arbitrary"),
        ),
        cost_estimate=pl.CostEstimate(
            flops=3 * L * n, transcendentals=0, bytes_accessed=bytes_accessed),
    )(a3, b2)

    return jnp.sum(partials) + tail


def detection_net_loss(x, x_hat, X_hat, use_layer_total_mse=False, *,
                       tile_rows=1024):
    """Pallas equivalent of DetectionNetLoss.forward."""
    if use_layer_total_mse:
        lead = X_hat.ndim - x.ndim
        if lead >= 0 and tuple(X_hat.shape[lead:]) == tuple(x.shape):
            # x.expand(*X_hat.size()) only tiles x along leading axes; express
            # that broadcast through the index_map (no materialized copy).
            L = 1
            for d in X_hat.shape[:lead]:
                L *= int(d)
            ssd = _pallas_sum_sq_diff(X_hat.reshape(L, x.size),
                                      x.reshape(-1), tile_rows=tile_rows)
        else:
            # General broadcast (size-1 dims inside x): rare fallback that
            # materializes the broadcast but still sums via the Pallas kernel.
            xb = jnp.broadcast_to(x, X_hat.shape)
            ssd = _pallas_sum_sq_diff(X_hat.reshape(1, -1),
                                      xb.reshape(-1), tile_rows=tile_rows)
        return ssd / jnp.float32(X_hat.size)
    else:
        assert x_hat.shape == x.shape, (x_hat.shape, x.shape)
        ssd = _pallas_sum_sq_diff(x_hat.reshape(1, -1),
                                  x.reshape(-1), tile_rows=tile_rows)
        return ssd / jnp.float32(x.size)


if __name__ == "__main__":
    key = jax.random.PRNGKey(0)
    k1, k2, k3 = jax.random.split(key, 3)

    # x / x_hat are (B, C, H, W); X_hat stacks L per-layer estimates.
    B, C, H, W, L = 2, 4, 16, 16, 3
    x = jax.random.normal(k1, (B, C, H, W), dtype=jnp.float32)
    x_hat = jax.random.normal(k2, (B, C, H, W), dtype=jnp.float32)
    X_hat = jax.random.normal(k3, (L, B, C, H, W), dtype=jnp.float32)

    # Default branch: mse(x_hat, x)
    loss = jax.block_until_ready(
        detection_net_loss(x, x_hat, X_hat, use_layer_total_mse=False))
    ref = jnp.mean((x_hat - x) ** 2)
    assert jnp.allclose(loss, ref, rtol=1e-5, atol=1e-6), (loss, ref)

    # Layer-total branch: mse(X_hat, broadcast(x)) -- index_map broadcast path.
    loss_lt = jax.block_until_ready(
        detection_net_loss(x, x_hat, X_hat, use_layer_total_mse=True))
    ref_lt = jnp.mean((X_hat - jnp.broadcast_to(x, X_hat.shape)) ** 2)
    assert jnp.allclose(loss_lt, ref_lt, rtol=1e-5, atol=1e-6), (loss_lt, ref_lt)

    # Ragged / multi-tile case: exercises the 2-way core split, in-kernel row
    # masking, clamped duplicate edge blocks and the JAX tail path.
    k4, k5, k6 = jax.random.split(k3, 3)
    x2 = jax.random.normal(k4, (5, 37, 129), dtype=jnp.float32)
    xh2 = jax.random.normal(k5, (5, 37, 129), dtype=jnp.float32)
    Xh2 = jax.random.normal(k6, (3, 5, 37, 129), dtype=jnp.float32)

    l2 = jax.block_until_ready(
        detection_net_loss(x2, xh2, Xh2, use_layer_total_mse=False, tile_rows=64))
    r2 = jnp.mean((xh2 - x2) ** 2)
    assert jnp.allclose(l2, r2, rtol=1e-5, atol=1e-6), (l2, r2)

    l3 = jax.block_until_ready(
        detection_net_loss(x2, xh2, Xh2, use_layer_total_mse=True, tile_rows=64))
    r3 = jnp.mean((Xh2 - jnp.broadcast_to(x2, Xh2.shape)) ** 2)
    assert jnp.allclose(l3, r3, rtol=1e-5, atol=1e-6), (l3, r3)

    # bf16 inputs stay bf16 over HBM; the f32 cast happens inside the kernel.
    xb = x.astype(jnp.bfloat16)
    xhb = x_hat.astype(jnp.bfloat16)
    lb = jax.block_until_ready(
        detection_net_loss(xb, xhb, X_hat, use_layer_total_mse=False))
    rb = jnp.mean((xhb.astype(jnp.float32) - xb.astype(jnp.float32)) ** 2)
    assert jnp.allclose(lb, rb, rtol=1e-4, atol=1e-6), (lb, rb)

    print("KERNEL_OK")
</pallas_src>

<mosaic_0001>
module attributes {stable_mosaic.version = 11 : i64} {
  func.func @kernel(%arg0: i32, %arg1: i32, %arg2: i32, %arg3: memref<1x16x128xf32, #tpu.memory_space<vmem>>, %arg4: memref<16x128xf32, #tpu.memory_space<vmem>>, %arg5: memref<8x128xf32, #tpu.memory_space<vmem>>) attributes {dimension_semantics = [#tpu.dimension_semantics<parallel>, #tpu.dimension_semantics<arbitrary>, #tpu.dimension_semantics<arbitrary>], iteration_bounds = array<i64: 1, 1, 1>, scalar_prefetch = 0 : i64, scratch_operands = 0 : i64, tpu.core_type = #tpu.core_type<tc>, window_params = [{transform_indices = @transform_0, window_bounds = array<i64: 1, 16, 128>}, {transform_indices = @transform_1, window_bounds = array<i64: 16, 128>}, {transform_indices = @transform_2, window_bounds = array<i64: 8, 128>}]} {
    %c0_i32 = arith.constant 0 : i32
    %0 = arith.cmpi eq, %arg1, %c0_i32 : i32
    %c0_i32_0 = arith.constant 0 : i32
    %1 = arith.cmpi eq, %arg2, %c0_i32_0 : i32
    %2 = arith.andi %0, %1 : i1
    %3 = arith.extui %2 : i1 to i32
    %c0_i32_1 = arith.constant 0 : i32
    %4 = arith.cmpi ne, %3, %c0_i32_1 : i32
    scf.if %4 {
      %cst_10 = arith.constant 0.000000e+00 : f32
      %15 = vector.broadcast %cst_10 : f32 to vector<8x128xf32>
      %c0_11 = arith.constant 0 : index
      %c0_12 = arith.constant 0 : index
      %16 = vector.load %arg5[%c0_11, %c0_12] : memref<8x128xf32, #tpu.memory_space<vmem>>, vector<8x128xf32>
      tpu.vector_store %arg5[%c0_11, %c0_12], %15 {strides = array<i32>} : memref<8x128xf32, #tpu.memory_space<vmem>>, vector<8x128xf32>,
    } else {
    }
    %c0 = arith.constant 0 : index
    %c0_2 = arith.constant 0 : index
    %c0_3 = arith.constant 0 : index
    %5 = vector.load %arg3[%c0, %c0_2, %c0_3] : memref<1x16x128xf32, #tpu.memory_space<vmem>>, vector<1x16x128xf32>
    %6 = vector.shape_cast %5 : vector<1x16x128xf32> to vector<16x128xf32>
    %c0_4 = arith.constant 0 : index
    %c0_5 = arith.constant 0 : index
    %7 = vector.load %arg4[%c0_4, %c0_5] : memref<16x128xf32, #tpu.memory_space<vmem>>, vector<16x128xf32>
    %8 = arith.subf %6, %7 : vector<16x128xf32>
    %9 = arith.mulf %8, %8 : vector<16x128xf32>
    %c0_6 = arith.constant 0 : index
    %c0_7 = arith.constant 0 : index
    %10 = vector.load %arg5[%c0_6, %c0_7] : memref<8x128xf32, #tpu.memory_space<vmem>>, vector<8x128xf32>
    %11 = vector.shape_cast %9 : vector<16x128xf32> to vector<2x8x128xf32>
    %cst = arith.constant dense<0.000000e+00> : vector<8x128xf32>
    %12 = vector.multi_reduction <add>, %11, %cst [0] : vector<2x8x128xf32> to vector<8x128xf32>
    %13 = arith.addf %10, %12 : vector<8x128xf32>
    %c0_8 = arith.constant 0 : index
    %c0_9 = arith.constant 0 : index
    %14 = vector.load %arg5[%c0_8, %c0_9] : memref<8x128xf32, #tpu.memory_space<vmem>>, vector<8x128xf32>
    tpu.vector_store %arg5[%c0_8, %c0_9], %13 {strides = array<i32>} : memref<8x128xf32, #tpu.memory_space<vmem>>, vector<8x128xf32>,
    return
  }
  func.func @transform_0(%arg0: i32, %arg1: i32, %arg2: i32) -> (i32, i32, i32) {
    %c1_i32 = arith.constant 1 : i32
    %0 = arith.muli %arg0, %c1_i32 : i32
    %1 = arith.addi %0, %arg1 : i32
    %c0_i32 = arith.constant 0 : i32
    %2 = arith.minsi %1, %c0_i32 : i32
    %c0_i32_0 = arith.constant 0 : i32
    %c0_i32_1 = arith.constant 0 : i32
    return %arg2, %2, %c0_i32_0 : i32, i32, i32
  }
  func.func @transform_1(%arg0: i32, %arg1: i32, %arg2: i32) -> (i32, i32) {
    %c1_i32 = arith.constant 1 : i32
    %0 = arith.muli %arg0, %c1_i32 : i32
    %1 = arith.addi %0, %arg1 : i32
    %c0_i32 = arith.constant 0 : i32
    %2 = arith.minsi %1, %c0_i32 : i32
    %c0_i32_0 = arith.constant 0 : i32
    %c0_i32_1 = arith.constant 0 : i32
    return %2, %c0_i32_0 : i32, i32
  }
  func.func @transform_2(%arg0: i32, %arg1: i32, %arg2: i32) -> (i32, i32) {
    %c0_i32 = arith.constant 0 : i32
    %c0_i32_0 = arith.constant 0 : i32
    return %arg0, %c0_i32 : i32, i32
  }
}

</mosaic_0001>

<bundles_post_ra>
// kernel: tpu_custom_call.1
= control target key start
LH: loop header
LB: loop body
LE: loop exit
PB: predicated region body
PF: predicated region fallthrough
CT: control target
= control target key end

     0   :  { %7 = vsyncpa [#allocation3], 0  ;;  %s233_s0 = inlined_call_operand.hbm [shape: f32[1,16,128], index: 0, kind: input, shape index: {}]   ;;  %s234_s1 = inlined_call_operand.hbm [shape: f32[16,128], index: 1, kind: input, shape index: {}]   ;;  %s235_s2 = inlined_call_operand.hbm [shape: f32[8,128], index: 2, kind: output, shape index: {}]  }
   0x1   :  { %8 = vsyncpa [#allocation6], 0 }
   0x2   :  { %9 = vsyncpa [#allocation4], 0  ;;  %s177_s9 = smov [#allocation2]   ;;  %s105_s13 = scalar_lea.hbm %s233_s0, 256 }
   0x3   :  { %s21_s10 = sshll.u32 %s177_s9, 4  ;;  %p106_p0 = scmp.ne.s32.totalorder %s233_s0, %s105_s13  ;;  %s22_s10 = int_to_ptr.vmem [resolvable:$true] %s21_s10 }
   0x4   :  { %p109_p1 = scmp.lt.u32.totalorder %s105_s13, %s233_s0 }
   0x6   :  { %p111_p2 = pnand %p109_p1, %p106_p0 }
   0x8   :  { %114 = shalt.err (!%p111_p2)
}
   0x9   :  { %s115_s18 = scalar_lea.vmem %s22_s10, 256  ;;  %p120_p4 = scmp.lt.s32.totalorder %s22_s10, %s22_s10 }
   0xa   :  { %p116_p3 = scmp.ne.s32.totalorder %s22_s10, %s115_s18  ;;  %p121_p5 = scmp.lt.s32.totalorder %s115_s18, %s115_s18 }
   0xc   :  { %p122_p6 = por %p121_p5, %p120_p4 }
   0xe   :  { %p123_p7 = pnand %p122_p6, %p116_p3 }
  0x10   :  { %126 = shalt.err (!%p123_p7)
}
  0x11   :  { %s178_s19 = smov 128   ;;  %s179_s20 = smov 8  }
  0x12   :  { %27 = dma.hbm_to_vmem [thread:$0]  %s233_s0, 256, %s22_s10, [#allocation3], %s178_s19, %s178_s19, %s179_s20  }
  0x13   :  { %s180_s23 = smov [#allocation5]   ;;  %s127_s27 = scalar_lea.hbm %s234_s1, 256 }
  0x14   :  { %s39_s24 = sshll.u32 %s180_s23, 4  ;;  %p128_p8 = scmp.ne.s32.totalorder %s234_s1, %s127_s27  ;;  %s40_s24 = int_to_ptr.vmem [resolvable:$true] %s39_s24 }
  0x15   :  { %p131_p9 = scmp.lt.u32.totalorder %s127_s27, %s234_s1 }
  0x17   :  { %p133_p10 = pnand %p131_p9, %p128_p8 }
  0x19   :  { %136 = shalt.err (!%p133_p10)
}
  0x1a   :  { %s137_s4 = scalar_lea.vmem %s40_s24, 256  ;;  %p142_p12 = scmp.lt.s32.totalorder %s40_s24, %s40_s24 }
  0x1b   :  { %p138_p11 = scmp.ne.s32.totalorder %s40_s24, %s137_s4  ;;  %p143_p13 = scmp.lt.s32.totalorder %s137_s4, %s137_s4 }
  0x1d   :  { %p144_p0 = por %p143_p13, %p142_p12 }
  0x1f   :  { %p145_p1 = pnand %p144_p0, %p138_p11 }
  0x21   :  { %148 = shalt.err (!%p145_p1)
}
  0x22   :  { %45 = dma.hbm_to_vmem [thread:$0]  %s234_s1, 256, %s40_s24, [#allocation6], %s178_s19, %s178_s19, %s179_s20  }
  0x23   :  { %171 = dma.done.wait [#allocation3], 256  }
  0x24   :  { %172 = vsyncadd [#allocation3], 4294967040 }
  0x25   :  { %173 = dma.done.wait [#allocation6], 256  }
  0x26   :  { %174 = vsyncadd [#allocation6], 4294967040  ;;  %v67_v0 = vld [vmem:[#allocation2] sm:$0xff]  ;;  %v68_v1 = vld [vmem:[#allocation2 + $0x8] sm:$0xff]  ;;  %s181_s6 = smov [#allocation7]  }
  0x27   :  { %v69_v2 = vld [vmem:[#allocation5] sm:$0xff]  ;;  %v70_v3 = vld [vmem:[#allocation5 + $0x8] sm:$0xff]  ;;  %s85_s7 = sshll.u32 %s181_s6, 4  ;;  %s86_s7 = int_to_ptr.vmem [resolvable:$true] %s85_s7 }
  0x28   :  { %v71_v4 = vsub.f32 %v67_v0, %v69_v2  ;;  %v72_v5 = vsub.f32 %v68_v1, %v70_v3  ;;  %s149_s8 = scalar_lea.vmem %s86_s7, 128  ;;  %p154_p3 = scmp.lt.s32.totalorder %s86_s7, %s86_s7 }
  0x29   :  { %p150_p2 = scmp.ne.s32.totalorder %s86_s7, %s149_s8  ;;  %p155_p4 = scmp.lt.s32.totalorder %s149_s8, %s149_s8 }
  0x2a   :  { %v73_v6 = vmul.f32 %v71_v4, %v71_v4  ;;  %v74_v7 = vmul.f32 %v72_v5, %v72_v5 }
  0x2b   :  { %p156_p5 = por %p155_p4, %p154_p3 }
  0x2c   :  { %v76_v8 = vadd.f32 %v74_v7, %v73_v6 }
  0x2d   :  { %p157_p6 = pnand %p156_p5, %p150_p2 }
  0x2e   :  { %78 = vst [vmem:[#allocation7] sm:$0xff] %v76_v8 }
  0x2f   :  { %160 = shalt.err (!%p157_p6)
}
  0x30   :  { %s161_s10 = scalar_lea.hbm %s235_s2, 128 }
  0x31   :  { %p162_p7 = scmp.ne.s32.totalorder %s235_s2, %s161_s10  ;;  %p165_p8 = scmp.lt.u32.totalorder %s161_s10, %s235_s2 }
  0x33   :  { %p167_p9 = pnand %p165_p8, %p162_p7 }
  0x35   :  { %170 = shalt.err (!%p167_p9)
}
  0x36   :  { %88 = dma.vmem_to_hbm [thread:$0]  %s86_s7, 128, %s235_s2, [#allocation4]  }
  0x37   :  { %175 = dma.done.wait [#allocation4], 128  }
  0x38   :  { %176 = vsyncadd [#allocation4], 4294967168 }
  0x39   :  { %92 = vsyncpa [#allocation3], 1 }
  0x3a   :  { %93 = vsyncpa [#allocation6], 1 }
  0x3b   :  { %94 = vsyncpa [#allocation4], 1 }

</bundles_post_ra>
